<compile_context>
chip_gen: v5e
topology: v5e:2x2
jax: 0.10.0
libtpu: 0.0.40
codegen_flags: <defaults>
</compile_context>

<pallas_src>
import jax
import jax.numpy as jnp
from jax.experimental import pallas as pl
from jax.experimental.pallas import tpu as pltpu


def _seq2seq_attn_kernel(dec_ref, enc_ref, out_ref):
    # dec_ref: (BT, 1, H) ; enc_ref: (BT, T, H) ; out_ref: (BT, 1, H)
    dec = dec_ref[...]                               # (BT, 1, H)
    enc = enc_ref[...]                               # (BT, T, H)

    # Lane-dense scores: (BT, 1, T). Batched contraction over H; no explicit
    # transpose of the encoder block is materialized.
    scores = jnp.einsum(
        "bsh,bth->bst", dec, enc, preferred_element_type=jnp.float32
    )                                                # (BT, 1, T)

    # Numerically stable softmax over T (the last / lane axis).
    m = jnp.max(scores, axis=-1, keepdims=True)      # (BT, 1, 1)
    p = jnp.exp(scores - m)                          # (BT, 1, T)
    denom = jnp.sum(p, axis=-1, keepdims=True)       # (BT, 1, 1)

    # Weighted sum of encoder states (contraction over T); normalize after the
    # matmul so the division touches H-length vectors once instead of the
    # T-length weights.
    ws = jnp.einsum(
        "bst,bth->bsh", p, enc, preferred_element_type=jnp.float32
    )                                                # (BT, 1, H)
    out = ws * pl.reciprocal(denom, approx=False)    # exact 1/x keeps f32 accuracy
    out_ref[...] = out.astype(out_ref.dtype)


def seq2seq_attention(
    decoder_hidden,
    encoder_states,
    *,
    block_b=None,
    vmem_budget_bytes=40 * 1024 * 1024,
):
    """decoder_hidden: [B, H], encoder_states: [B, T, H] -> [B, H]"""
    B, H = decoder_hidden.shape
    Bt, T, He = encoder_states.shape
    assert B == Bt and H == He

    if block_b is None:
        itemsize = jnp.dtype(encoder_states.dtype).itemsize
        # Double-buffered per-row footprint: encoder tile (T, H) dominates, but
        # also count the dec/out (1, H) tiles so the estimate stays honest.
        bytes_per_row = 2 * (T * H + 2 * H) * itemsize
        block_b = int(max(1, min(B, vmem_budget_bytes // max(bytes_per_row, 1), 128)))
        if B >= 2:
            # Keep >=2 batch blocks so the parallel grid axis can span both
            # TensorCores on v7x (still amortizes per-step overhead).
            block_b = min(block_b, max(1, B // 2))
    block_b = int(block_b)
    # block_b must evenly divide B (this kernel has no partial-block masking).
    while B % block_b != 0:
        block_b -= 1

    # TODO(synk): if a single (1, T, H) encoder block is too large for VMEM
    # (huge T*H), add a second 'arbitrary' grid axis over T with an
    # online-softmax (m, l, acc) accumulator instead of holding the full
    # sequence per step.

    # Present the decoder state as (B, 1, H) so all in-kernel contractions are
    # batched 3-D einsums in the same layout family as the encoder block, and
    # so the last-two block dims always equal the full array dims (no (8, 128)
    # divisibility constraint on small H / T).
    dec3 = decoder_hidden[:, None, :]

    grid = (B // block_b,)

    out3 = pl.pallas_call(
        _seq2seq_attn_kernel,
        out_shape=jax.ShapeDtypeStruct((B, 1, H), decoder_hidden.dtype),
        grid_spec=pltpu.PrefetchScalarGridSpec(
            num_scalar_prefetch=0,
            grid=grid,
            in_specs=[
                pl.BlockSpec((block_b, 1, H), lambda b: (b, 0, 0)),
                pl.BlockSpec((block_b, T, H), lambda b: (b, 0, 0)),
            ],
            out_specs=pl.BlockSpec((block_b, 1, H), lambda b: (b, 0, 0)),
        ),
        compiler_params=pltpu.CompilerParams(
            dimension_semantics=("parallel",),
            vmem_limit_bytes=56 * 1024 * 1024,
        ),
    )(dec3, encoder_states)

    return out3[:, 0, :]


def _reference(decoder_hidden, encoder_states):
    # Pure-JAX reference mirroring the PyTorch forward.
    dec = decoder_hidden[:, :, None]                         # [B, H, 1]
    scores = jnp.matmul(encoder_states, dec)                 # [B, T, 1]
    w = jax.nn.softmax(scores, axis=1)                       # softmax over T
    out = jnp.matmul(jnp.swapaxes(w, 2, 1), encoder_states)  # [B, 1, H]
    return jnp.squeeze(out, axis=1)                          # [B, H]


if __name__ == "__main__":
    key = jax.random.PRNGKey(0)
    k1, k2 = jax.random.split(key)

    B, T, H = 4, 8, 32
    decoder_hidden = jax.random.normal(k1, (B, H), dtype=jnp.float32)
    encoder_states = jax.random.normal(k2, (B, T, H), dtype=jnp.float32)

    out = seq2seq_attention(decoder_hidden, encoder_states)
    out = jax.block_until_ready(out)

    ref = _reference(decoder_hidden, encoder_states)
    assert out.shape == (B, H)
    assert jnp.allclose(out, ref, atol=1e-5, rtol=1e-5), "mismatch vs reference"

    print("KERNEL_OK")
</pallas_src>

<mosaic_0001>
module attributes {stable_mosaic.version = 11 : i64} {
  func.func @_seq2seq_attn_kernel(%arg0: i32, %arg1: memref<2x1x32xf32, #tpu.memory_space<vmem>>, %arg2: memref<2x8x32xf32, #tpu.memory_space<vmem>>, %arg3: memref<2x1x32xf32, #tpu.memory_space<vmem>>) attributes {dimension_semantics = [#tpu.dimension_semantics<parallel>], iteration_bounds = array<i64: 2>, scalar_prefetch = 0 : i64, scratch_operands = 0 : i64, tpu.core_type = #tpu.core_type<tc>, window_params = [{transform_indices = @transform_0, window_bounds = array<i64: 2, 1, 32>}, {transform_indices = @transform_1, window_bounds = array<i64: 2, 8, 32>}, {transform_indices = @transform_2, window_bounds = array<i64: 2, 1, 32>}]} {
    %c0 = arith.constant 0 : index
    %c0_0 = arith.constant 0 : index
    %c0_1 = arith.constant 0 : index
    %0 = vector.load %arg1[%c0, %c0_0, %c0_1] : memref<2x1x32xf32, #tpu.memory_space<vmem>>, vector<2x1x32xf32>
    %c0_2 = arith.constant 0 : index
    %c0_3 = arith.constant 0 : index
    %c0_4 = arith.constant 0 : index
    %1 = vector.load %arg2[%c0_2, %c0_3, %c0_4] : memref<2x8x32xf32, #tpu.memory_space<vmem>>, vector<2x8x32xf32>
    "tpu.trace_start"() <{level = 10 : i32, message = "bsh,bth->bst"}> : () -> ()
    %cst = arith.constant dense<0.000000e+00> : vector<2x1x8xf32>
    %2 = tpu.matmul %0, %1, %cst {dimension_numbers = #tpu.dot_dimension_numbers<[2], [2], [1], [1], [0, 0, 0, 1, 1, 1], [0], [0]>} : vector<2x1x32xf32>, vector<2x8x32xf32>, vector<2x1x8xf32> -> vector<2x1x8xf32>
    "tpu.trace_stop"() : () -> ()
    %cst_5 = arith.constant dense<0xFF800000> : vector<2x1xf32>
    %3 = vector.multi_reduction <maximumf>, %2, %cst_5 [2] : vector<2x1x8xf32> to vector<2x1xf32>
    %4 = vector.shape_cast %3 : vector<2x1xf32> to vector<2x1x1xf32>
    %5 = vector.broadcast %4 : vector<2x1x1xf32> to vector<2x1x8xf32>
    %6 = arith.subf %2, %5 : vector<2x1x8xf32>
    %7 = math.exp %6 : vector<2x1x8xf32>
    %cst_6 = arith.constant dense<0.000000e+00> : vector<2x1xf32>
    %8 = vector.multi_reduction <add>, %7, %cst_6 [2] : vector<2x1x8xf32> to vector<2x1xf32>
    %9 = vector.shape_cast %8 : vector<2x1xf32> to vector<2x1x1xf32>
    "tpu.trace_start"() <{level = 10 : i32, message = "bst,bth->bsh"}> : () -> ()
    %cst_7 = arith.constant dense<0.000000e+00> : vector<2x1x32xf32>
    %10 = tpu.matmul %7, %1, %cst_7 {dimension_numbers = #tpu.dot_dimension_numbers<[2], [1], [1], [2], [0, 0, 0, 1, 1, 2], [0], [0]>} : vector<2x1x8xf32>, vector<2x8x32xf32>, vector<2x1x32xf32> -> vector<2x1x32xf32>
    "tpu.trace_stop"() : () -> ()
    %11 = tpu.reciprocal %9 : vector<2x1x1xf32> -> vector<2x1x1xf32>
    %12 = vector.broadcast %11 : vector<2x1x1xf32> to vector<2x1x32xf32>
    %13 = arith.mulf %10, %12 : vector<2x1x32xf32>
    %c0_8 = arith.constant 0 : index
    %c0_9 = arith.constant 0 : index
    %c0_10 = arith.constant 0 : index
    %14 = vector.load %arg3[%c0_8, %c0_9, %c0_10] : memref<2x1x32xf32, #tpu.memory_space<vmem>>, vector<2x1x32xf32>
    tpu.vector_store %arg3[%c0_8, %c0_9, %c0_10], %13 {strides = array<i32>} : memref<2x1x32xf32, #tpu.memory_space<vmem>>, vector<2x1x32xf32>,
    return
  }
  func.func @transform_0(%arg0: i32) -> (i32, i32, i32) {
    %c0_i32 = arith.constant 0 : i32
    %c0_i32_0 = arith.constant 0 : i32
    %c0_i32_1 = arith.constant 0 : i32
    return %arg0, %c0_i32, %c0_i32_0 : i32, i32, i32
  }
  func.func @transform_1(%arg0: i32) -> (i32, i32, i32) {
    %c0_i32 = arith.constant 0 : i32
    %c0_i32_0 = arith.constant 0 : i32
    %c0_i32_1 = arith.constant 0 : i32
    return %arg0, %c0_i32, %c0_i32_0 : i32, i32, i32
  }
  func.func @transform_2(%arg0: i32) -> (i32, i32, i32) {
    %c0_i32 = arith.constant 0 : i32
    %c0_i32_0 = arith.constant 0 : i32
    %c0_i32_1 = arith.constant 0 : i32
    return %arg0, %c0_i32, %c0_i32_0 : i32, i32, i32
  }
}

</mosaic_0001>

<bundles_post_ra>
// kernel: tpu_custom_call.1
= control target key start
LH: loop header
LB: loop body
LE: loop exit
PB: predicated region body
PF: predicated region fallthrough
CT: control target
= control target key end

     0   :  { %7 = vsyncpa [#allocation3], 0  ;;  %s889_s0 = inlined_call_operand.hbm [shape: f32[4,1,32], index: 0, kind: input, shape index: {}]   ;;  %s890_s1 = inlined_call_operand.hbm [shape: f32[4,8,32], index: 1, kind: input, shape index: {}]   ;;  %s891_s2 = inlined_call_operand.hbm [shape: f32[4,1,32], index: 2, kind: output, shape index: {}]  }
   0x1   :  { %9 = vsyncpa [#allocation3 + $0x1], 0 }
   0x2   :  { %10 = vsyncpa [#allocation6], 0 }
   0x3   :  { %12 = vsyncpa [#allocation6 + $0x1], 0 }
   0x4   :  { %13 = vsyncpa [#allocation4], 0 }
   0x5   :  { %15 = vsyncpa [#allocation4 + $0x1], 0  ;;  %s716_s9 = smov 0   ;;  %s718_s10 = smov 0  }
   0x6   :  { %s720_s11 = smov 0   ;;  %s722_s12 = smov 0  }
   0x7 LB: > { %s737_s13 = sadd.s32 4294967295, %s693_s12   ;;  %s475_s14 = sadd.s32 4294967294, %s693_s12   ;;  %s693_s12 = sphi %s722_s12, %s902_s12   ;;  %s689_s11 = sphi %s720_s11, %s901_s11   ;;  %s685_s10 = sphi %s718_s10, %s900_s10   ;;  %s681_s9 = sphi %s716_s9, %s899_s9  }
   0x8   : > { %s741_s15 = sadd.s32 1, %s693_s12   ;;  %s28_s16 = sadd.s32 1, %s689_s11 }
   0x9   : > { %s25_s17 = ssub.s32 %s693_s12, %s741_s15  ;;  %p35_p0 = scmp.ne.s32.totalorder %s689_s11, %s685_s10 }
   0xa   : > { %p26_p1 = scmp.eq.s32.totalorder %s25_s17, 0  ;;  %p36_p2 = scmp.eq.s32.totalorder %s693_s12, 0 }
   0xb   : > { %p41_p3 = scmp.ne.s32.totalorder %s685_s10, %s681_s9  ;;  %p42_p4 = scmp.eq.s32.totalorder %s737_s13, 0 }
   0xc   : > { %s753_s18 = scalar_select %p26_p1, %s689_s11, %s28_s16  }
   0xd   : > { %p755_p5 = por %p36_p2, %p35_p0  ;;  %p759_p6 = por %p42_p4, %p41_p3 }
   0xe   : > { %p91_p7 = scmp.eq.s32.totalorder %s737_s13, 1  ;;  %p97_p8 = scmp.eq.s32.totalorder %s475_s14, 1 }
   0xf   : > { %p515_p10 = scmp.lt.s32.totalorder %s693_s12, 2  ;;  %s775_s23 = sand.u32 1, %s689_s11  }
  0x10   : > { %p766_p11 = por %p91_p7, %p35_p0  ;;  %p770_p12 = por %p97_p8, %p41_p3 }
  0x11   : > { %s479_s24 = sshll.u32 %s693_s12, 1  ;;  %s478_s25 = sshll.u32 %s775_s23, 1 }
  0x12   : > { %s125_s28 = scalar_lea.hbm %s889_s0, %s479_s24  ;;  %s121_s30 = scalar_lea.vmem [#allocation2], %s478_s25 }
  0x13   : > { %s126_s29 = sshll.u32 %s125_s28, 4  ;;  %s128_s3 = sshll.u32 %s121_s30, 4  ;;  %s127_s29 = int_to_ptr.hbm [resolvable:$true] %s126_s29  ;;  %s129_s3 = int_to_ptr.vmem [resolvable:$true] %s128_s3 }
  0x14   : > { %p784_p13 = pnand %p515_p10, %p755_p5  ;;  %p483_p0 = scmp.ge.s32.totalorder %s693_s12, 1 }
  0x15   : > { %p158_p1 = scmp.lt.s32.totalorder %s693_s12, 3  ;;  %s118_s5 = scalar_lea.sflag [#allocation3], %s775_s23 }
  0x16   : > { %s563_s6 = sshra.s32 %s127_s29, 4  ;;  %p567_p3 = pneg %p784_p13  ;;  %s564_s6 = int_to_ptr.hbm [resolvable:$true] %s563_s6 }
  0x17   : > { %s565_s7 = scalar_lea.hbm %s564_s6, 2  ;;  %s570_s16 = scalar_lea.hbm %s889_s0, 4 }
  0x18   : > { %p566_p2 = scmp.ne.s32.totalorder %s564_s6, %s565_s7  ;;  %p571_p5 = scmp.lt.s32.totalorder %s564_s6, %s889_s0 }
  0x19   : > { %p572_p8 = scmp.lt.s32.totalorder %s570_s16, %s565_s7 }
  0x1a   : > { %p568_p4 = pnand %p567_p3, %p566_p2 }
  0x1b   : > { %p573_p10 = por %p572_p8, %p571_p5 }
  0x1c   : > { %p569_p7 = pneg %p568_p4 }
  0x1e   : > { %p574_p9 = pnand %p573_p10, %p569_p7 }
  0x20   : > { %577 = shalt.err (!%p574_p9)
}
  0x21   : > { %s695_s24 = smov 16   ;;  %s696_s25 = smov 1  }
  0x22   : > { %507 = dma.hbm_to_vmem [thread:$0]  (!%p784_p13), %s127_s29, 32, %s129_s3, %s118_s5, %s695_s24, %s695_s24, %s696_s25  }
  0x23   : > { %p808_p2 = pnand %p483_p0, %p158_p1  ;;  %s480_s27 = sshll.u32 %s775_s23, 4 }
  0x24   : > { %s497_s28 = sshll.u32 %s693_s12, 4  ;;  %s142_s14 = scalar_lea.vmem [#allocation5], %s480_s27 }
  0x25   : > { %s147_s7 = scalar_lea.hbm %s890_s1, %s497_s28  ;;  %s150_s16 = sshll.u32 %s142_s14, 4  ;;  %s151_s16 = int_to_ptr.vmem [resolvable:$true] %s150_s16 }
  0x26   : > { %s148_s8 = sshll.u32 %s147_s7, 4  ;;  %s139_s17 = scalar_lea.sflag [#allocation6], %s775_s23  ;;  %s149_s8 = int_to_ptr.hbm [resolvable:$true] %s148_s8 }
  0x27   : > { %s593_s19 = sshra.s32 %s149_s8, 4  ;;  %s600_s24 = scalar_lea.hbm %s890_s1, 32  ;;  %s594_s19 = int_to_ptr.hbm [resolvable:$true] %s593_s19 }
  0x28   : > { %s595_s29 = scalar_lea.hbm %s594_s19, 16  ;;  %p601_p4 = scmp.lt.s32.totalorder %s594_s19, %s890_s1 }
  0x29   : > { %p596_p9 = scmp.ne.s32.totalorder %s594_s19, %s595_s29  ;;  %p602_p7 = scmp.lt.s32.totalorder %s600_s24, %s595_s29 }
  0x2b   : > { %p598_p0 = pnand %p596_p9, %p567_p3  ;;  %p603_p5 = por %p602_p7, %p601_p4 }
  0x2d   : > { %p599_p1 = pneg %p598_p0 }
  0x2f   : > { %p604_p8 = pnand %p603_p5, %p599_p1 }
  0x31   : > { %607 = shalt.err (!%p604_p8)
}
  0x32   : > { %s697_s23 = smov 128   ;;  %s698_s27 = smov 8  }
  0x33   : > { %510 = dma.hbm_to_vmem [thread:$0]  (!%p784_p13), %s149_s8, 256, %s151_s16, %s139_s17, %s697_s23, %s697_s23, %s698_s27  }
  0x34   : > { %162 = sbr.rel (%p808_p2) target bundleno = 467 (0x1d3), region = 28  ;;  %s832_s30 = sand.u32 (!%p808_p2), 1, %s685_s10  }
  0x35   : > { %s484_s6 = sshll.u32 (!%p808_p2), %s832_s30, 1  ;;  %s165_s7 = scalar_lea.sflag (!%p808_p2), [#allocation3], %s832_s30 }
  0x36   : > { %s168_s14 = scalar_lea.vmem (!%p808_p2), [#allocation2], %s484_s6 }
  0x39   : > { %668 = dma.done.wait (%p759_p6), %s165_s7, 32  }
  0x3a   : > { %670 = vsyncadd (%p759_p6), %s165_s7, 4294967264  ;;  %s485_s4 = sshll.u32 %s832_s30, 4  ;;  %s175_s26 = scalar_lea.sflag [#allocation6], %s832_s30 }
  0x3b   : > { %s178_s8 = scalar_lea.vmem [#allocation5], %s485_s4 }
  0x3c   : > { %672 = dma.done.wait (%p759_p6), %s175_s26, 256  }
  0x3d   : > { %674 = vsyncadd (%p759_p6), %s175_s26, 4294967040  ;;  %vm212_vm0 = vcmask 261120   ;;  %v210_v0 = vld [vmem:[%s178_s8] sm:$0xff]  ;;  %v211_v1 = vld [vmem:[%s178_s8 + $0x8] sm:$0xff]  ;;  %vm265_vm1 = vcmask 57344   ;;  %vm284_vm2 = vcmask 64512  }
  0x3e   : > { %487 = vmatpush.xpose.msk.msra.mxu0 %vm212_vm0, %v210_v0  ;;  %v208_v2 = vld [vmem:[%s168_s14] sm:$0x1]  ;;  %489 = vmatpush.xpose.msk.msra.mxu1 %vm212_vm0, %v211_v1  ;;  %v209_v3 = vld [vmem:[%s168_s14 + $0x1] sm:$0x1]  ;;  %s494_s20 = sshll.u32 %s737_s13, 1  ;;  %vm361_vm7 = vcmask 253952  }
  0x3f   : > { %303 = vmatpush.msra.mxu2 %v210_v0  ;;  %326 = vmatpush.msra.mxu3 %v211_v1  ;;  %s375_s19 = scalar_lea.hbm %s891_s2, %s494_s20  ;;  %s204_s29 = scalar_lea.vmem [#allocation7], %s484_s6 }
  0x40   : > { %s376_s3 = sshll.u32 %s204_s29, 4  ;;  %s378_s13 = sshll.u32 %s375_s19, 4  ;;  %s377_s3 = int_to_ptr.vmem [resolvable:$true] %s376_s3  ;;  %s379_s13 = int_to_ptr.hbm [resolvable:$true] %s378_s13 }
  0x41   : > { %488 = vmatmul.msk.f32.vlgmr.msra.gmra.mxu0 %vm212_vm0, %v208_v2  ;;  %490 = vmatmul.msk.f32.vlgmr.msra.gmra.mxu1 %vm212_vm0, %v209_v3  ;;  %s365_s5 = scalar_lea.sflag [#allocation4], %s832_s30  ;;  %s637_s24 = sshra.s32 %s379_s13, 4  ;;  %s638_s24 = int_to_ptr.hbm [resolvable:$true] %s637_s24 }
  0x42   : > { %s639_s25 = scalar_lea.hbm %s638_s24, 2  ;;  %s643_s27 = scalar_lea.hbm %s891_s2, 4 }
  0x43   : > { %p640_p6 = scmp.ne.s32.totalorder %s638_s24, %s639_s25  ;;  %p644_p10 = scmp.lt.s32.totalorder %s638_s24, %s891_s2 }
  0x44   : > { %p645_p2 = scmp.lt.s32.totalorder %s643_s27, %s639_s25 }
  0x45   : > { %p641_p13 = pnand %p640_p6, %p766_p11 }
  0x46   : > { %p646_p9 = por %p645_p2, %p644_p10 }
  0x47   : > { %p642_p3 = pneg %p641_p13 }
  0x49   : > { %p647_p0 = pnand %p646_p9, %p642_p3 }
  0xbe   : > { %v236_v4 = vpop.f32.mrf.mxu0  ;;  %v262_v6 = vpop.f32.mrf.mxu1 }
  0xbf   : > { %v266_v5 = vsel %vm265_vm1, %v236_v4, -inf  ;;  %v269_v7 = vsel %vm265_vm1, %v262_v6, -inf }
  0xc0   : > { %267 = vmax.xlane.f32.xlu0 %v266_v5 }
  0xc8   : > { %270 = vmax.xlane.f32.xlu0 %v269_v7 }
 0x133   : > { %v268_v8 = vpop.xlane.xlu0 %267 }
 0x134   : > { %v272_v9 = vsub.f32 %v236_v4, %v268_v8 }
 0x136   : > { %v274_v10 = vmul.f32 1.442695, %v272_v9 }
 0x138   : > { %555 = vpow2.f32 %v274_v10 }
 0x13b   : > { %v271_v11 = vpop.xlane.xlu0 %270 }
 0x13c   : > { %v273_v12 = vsub.f32 %v262_v6, %v271_v11 }
 0x13e   : > { %v556_v13 = vpop.eup %555  ;;  %v276_v14 = vmul.f32 1.442695, %v273_v12 }
 0x13f   : > { %491 = vmatmul.msk.f32.vlgmr.msra.gmra.mxu2 %vm284_vm2, %v556_v13  ;;  %v278_v15 = vsel %vm265_vm1, %v556_v13, 0.0 }
 0x140   : > { %557 = vpow2.f32 %v276_v14  ;;  %279 = vadd.xlane.f32.xlu1 %v278_v15 }
 0x146   : > { %v558_v16 = vpop.eup %557 }
 0x147   : > { %492 = vmatmul.msk.f32.vlgmr.msra.gmra.mxu3 %vm284_vm2, %v558_v16  ;;  %v281_v17 = vsel %vm265_vm1, %v558_v16, 0.0 }
 0x148   : > { %282 = vadd.xlane.f32.xlu1 %v281_v17 }
 0x1b3   : > { %v280_v18 = vpop.xlane.xlu1 %279 }
 0x1b4   : > { %559 = vrcp.f32 %v280_v18  ;;  %v342_v23 = vand.u32 2147483648, %v280_v18  ;;  %v340_v25 = vand.u32 2147483647, %v280_v18  ;;  %vm336_vm4 = vweird.f32 %v280_v18 }
 0x1b6   : > { %v343_v28 = vor.u32 1.1754944e-38, %v342_v23  ;;  %vm341_vm6 = vcmp.eq.f32.partialorder %v340_v25, 8.507059e+37 }
 0x1ba   : > { %v560_v19 = vpop.eup %559 }
 0x1bb   : > { %v332_v20 = vmul.f32 %v560_v19, %v280_v18  ;;  %v283_v21 = vpop.xlane.xlu1 %282  ;;  %vm337_vm3 = vweird.f32 %v560_v19 }
 0x1bc   : > { %561 = vrcp.f32 %v283_v21  ;;  %vm338_vm5 = vmor %vm336_vm4, %vm337_vm3  ;;  %v356_v35 = vand.u32 2147483648, %v283_v21  ;;  %v354_v37 = vand.u32 2147483647, %v283_v21  ;;  %vm350_vm9 = vweird.f32 %v283_v21 }
 0x1bd   : > { %v333_v22 = vsub.f32 1.0, %v332_v20 }
 0x1be   : > { %v357_v39 = vor.u32 1.1754944e-38, %v356_v35  ;;  %vm355_vm11 = vcmp.eq.f32.partialorder %v354_v37, 8.507059e+37 }
 0x1bf   : > { %v334_v24 = vmul.f32 %v560_v19, %v333_v22 }
 0x1c1   : > { %v335_v26 = vadd.f32 %v560_v19, %v334_v24 }
 0x1c2   : > { %v562_v27 = vpop.eup %561  ;;  %v305_v31 = vpop.f32.mrf.mxu2 }
 0x1c3   : > { %v346_v29 = vmul.f32 %v562_v27, %v283_v21  ;;  %v339_v30 = vsel %vm338_vm5, %v560_v19, %v335_v26  ;;  %vm351_vm8 = vweird.f32 %v562_v27 }
 0x1c4   : > { %v344_v32 = vsel %vm341_vm6, %v343_v28, %v339_v30  ;;  %vm352_vm10 = vmor %vm350_vm9, %vm351_vm8 }
 0x1c5   : > { %v347_v33 = vsub.f32 1.0, %v346_v29  ;;  %v359_v34 = vmul.f32 %v344_v32, %v305_v31 }
 0x1c7   : > { %v348_v36 = vmul.f32 %v562_v27, %v347_v33  ;;  %362 = vst.msk [vmem:[%s204_s29] sm:$0x1] %vm361_vm7, %v359_v34 }
 0x1c9   : > { %v349_v38 = vadd.f32 %v562_v27, %v348_v36 }
 0x1ca   : > { %v328_v41 = vpop.f32.mrf.mxu3 }
 0x1cb   : > { %v353_v40 = vsel %vm352_vm10, %v562_v27, %v349_v38 }
 0x1cc   : > { %v358_v42 = vsel %vm355_vm11, %v357_v39, %v353_v40 }
 0x1cd   : > { %v360_v43 = vmul.f32 %v358_v42, %v328_v41 }
 0x1cf   : > { %363 = vst.msk [vmem:[%s204_s29 + $0x1] sm:$0x1] %vm361_vm7, %v360_v43 }
 0x1d0   : > { %650 = shalt.err (!%p647_p0)
}
 0x1d1   : > { %s699_s30 = smov 16   ;;  %s700_s14 = smov 1  }
 0x1d2   : > { %502 = dma.vmem_to_hbm [thread:$0]  (%p766_p11), %s377_s3, 32, %s379_s13, %s365_s5, %s699_s30, %s699_s30, %s700_s14  }
 0x1d3 PF: > { %s393_s4 = sand.u32 1, %s681_s9   ;;  %p898_p1 = scmp.ge.s32.totalorder %s693_s12, 2 }
 0x1d4   : > { %s394_s26 = scalar_lea.sflag [#allocation4], %s393_s4 }
 0x1d5   : > { %p512_p4 = pnand %p898_p1, %p770_p12 }
 0x1d7   : > { %p513_p7 = pneg %p512_p4 }
 0x1d9   : > { %676 = dma.done.wait (%p513_p7), %s394_s26, 32  }
 0x1da   : > { %678 = vsyncadd (%p513_p7), %s394_s26, 4294967264  ;;  %p18_p5 = scmp.ge.s32.totalorder %s741_s15, 4   ;;  %s899_s9 = smov %s685_s10 }
 0x1db   : > { %s900_s10 = smov %s689_s11  ;;  %s901_s11 = smov %s753_s18 }
 0x1dc   : > { %s902_s12 = smov %s741_s15  ;;  %20 = sbr.rel (!%p18_p5) target bundleno = 7 (0x7), region = 86 }
 0x1e1   :  { %400 = vsyncpa [#allocation3], 1 }
 0x1e2   :  { %402 = vsyncpa [#allocation3 + $0x1], 1 }
 0x1e3   :  { %403 = vsyncpa [#allocation6], 1 }
 0x1e4   :  { %405 = vsyncpa [#allocation6 + $0x1], 1 }
 0x1e5   :  { %406 = vsyncpa [#allocation4], 1 }
 0x1e6   :  { %408 = vsyncpa [#allocation4 + $0x1], 1 }

</bundles_post_ra>
